<compile_context>
chip_gen: v7x
topology: tpu7x:2x2x1
jax: 0.10.0
libtpu: 0.0.40
codegen_flags: <defaults>
</compile_context>

<pallas_src>
import jax
import jax.numpy as jnp
from jax.experimental import pallas as pl
from jax.experimental.pallas import tpu as pltpu

IN_DIM = 30 * 6   # 180
H1 = 100
H2 = 50
OUT_DIM = 30


def _round_up(n, m):
    return ((n + m - 1) // m) * m


def _mlp_kernel(x_ref, w1_ref, b1_ref, w2_ref, b2_ref, w3_ref, b3_ref, o_ref):
    # In-kernel bf16 cast of x (hidden under MXU work); f32 accumulation.
    x = x_ref[...].astype(jnp.bfloat16)                               # (TB, 180) bf16
    h1 = jnp.dot(x, w1_ref[...], preferred_element_type=jnp.float32)  # (TB, 100) f32
    h1 = jnp.maximum(h1 + b1_ref[...], 0.0)
    h2 = jnp.dot(h1.astype(jnp.bfloat16), w2_ref[...],
                 preferred_element_type=jnp.float32)                  # (TB, 50) f32
    h2 = jnp.maximum(h2 + b2_ref[...], 0.0)
    o = jnp.dot(h2.astype(jnp.bfloat16), w3_ref[...],
                preferred_element_type=jnp.float32)                   # (TB, 30) f32
    o_ref[...] = (o + b3_ref[...]).astype(o_ref.dtype)


def net_forward(x, params, tb=4096):
    """x: [B, 180] float32. params: (in,out)-layout bf16 weights + (1,out) f32 biases."""
    B = x.shape[0]
    # Batch tile: multiple of 8 (f32 sublane), no larger than needed for B.
    TB = _round_up(min(tb, B), 8)
    grid = (pl.cdiv(B, TB),)   # ragged tail handled by Pallas partial last block

    # No-ops if params are already bf16 (init_params emits bf16 directly).
    w1 = params["w1"].astype(jnp.bfloat16)
    w2 = params["w2"].astype(jnp.bfloat16)
    w3 = params["w3"].astype(jnp.bfloat16)
    b1, b2, b3 = params["b1"], params["b2"], params["b3"]

    const2d = lambda i: (0, 0)   # weights/biases: DMA'd once, VMEM-resident
    return pl.pallas_call(
        _mlp_kernel,
        out_shape=jax.ShapeDtypeStruct((B, OUT_DIM), jnp.float32),
        grid=grid,
        in_specs=[
            pl.BlockSpec((TB, IN_DIM), lambda i: (i, 0)),     # x: tiled over batch
            pl.BlockSpec((IN_DIM, H1), const2d),              # w1
            pl.BlockSpec((1, H1), const2d),                   # b1
            pl.BlockSpec((H1, H2), const2d),                  # w2
            pl.BlockSpec((1, H2), const2d),                   # b2
            pl.BlockSpec((H2, OUT_DIM), const2d),             # w3
            pl.BlockSpec((1, OUT_DIM), const2d),              # b3
        ],
        out_specs=pl.BlockSpec((TB, OUT_DIM), lambda i: (i, 0)),
        compiler_params=pltpu.CompilerParams(
            dimension_semantics=("parallel",),
            vmem_limit_bytes=32 * 1024 * 1024,
        ),
    )(x, w1, b1, w2, b2, w3, b3)


def init_params(key):
    """PyTorch nn.Linear stores weight as (out, in) and computes y = x @ W.T + b;
    we store the transposed (in, out) layout (bf16) so the kernel does a plain
    matmul on the MXU's native bf16 path; biases stay f32."""
    k1, k2, k3, k4, k5, k6 = jax.random.split(key, 6)

    def linear(kw, kb, fan_in, fan_out):
        bound = 1.0 / jnp.sqrt(jnp.float32(fan_in))
        w = jax.random.uniform(kw, (fan_in, fan_out), jnp.float32, -bound, bound)
        b = jax.random.uniform(kb, (1, fan_out), jnp.float32, -bound, bound)
        return w.astype(jnp.bfloat16), b

    w1, b1 = linear(k1, k2, IN_DIM, H1)
    w2, b2 = linear(k3, k4, H1, H2)
    w3, b3 = linear(k5, k6, H2, OUT_DIM)
    return {"w1": w1, "b1": b1, "w2": w2, "b2": b2, "w3": w3, "b3": b3}


def net_forward_ref_bf16(x, p):
    """Reference using the identical bf16-operand / f32-accumulate scheme."""
    xb = x.astype(jnp.bfloat16)
    h1 = jnp.maximum(
        jnp.dot(xb, p["w1"], preferred_element_type=jnp.float32) + p["b1"], 0.0)
    h2 = jnp.maximum(
        jnp.dot(h1.astype(jnp.bfloat16), p["w2"],
                preferred_element_type=jnp.float32) + p["b2"], 0.0)
    return jnp.dot(h2.astype(jnp.bfloat16), p["w3"],
                   preferred_element_type=jnp.float32) + p["b3"]


def net_forward_ref_f32(x, p):
    """Full-f32 math on the (bf16-stored) parameters."""
    w1 = p["w1"].astype(jnp.float32)
    w2 = p["w2"].astype(jnp.float32)
    w3 = p["w3"].astype(jnp.float32)
    h1 = jnp.maximum(x @ w1 + p["b1"], 0.0)
    h2 = jnp.maximum(h1 @ w2 + p["b2"], 0.0)
    return h2 @ w3 + p["b3"]


if __name__ == "__main__":
    key = jax.random.PRNGKey(0)
    kx, kp = jax.random.split(key)

    # Small shapes; tb=16 forces a multi-step grid (grid=3) whose last block is
    # ragged (rows 32..39 valid of a 16-row block), exercising the padless
    # partial-block / masked-store path.
    batch = 40
    x = jax.random.normal(kx, (batch, IN_DIM), jnp.float32)
    params = init_params(kp)

    out = net_forward(x, params, tb=16)
    out = jax.block_until_ready(out)
    assert out.shape == (batch, OUT_DIM)

    # Tight check vs. a reference using the identical bf16/f32-accum scheme.
    ref_bf16 = net_forward_ref_bf16(x, params)
    assert jnp.allclose(out, ref_bf16, atol=1e-2, rtol=1e-2)

    # Loose sanity check vs. f32 math (bf16 operand/activation rounding only).
    ref_f32 = net_forward_ref_f32(x, params)
    assert jnp.allclose(out, ref_f32, atol=5e-2, rtol=5e-2)

    print("KERNEL_OK")
</pallas_src>

<mosaic_0001>
module attributes {stable_mosaic.version = 11 : i64} {
  func.func @_mlp_kernel(%arg0: i32, %arg1: memref<16x180xf32, #tpu.memory_space<vmem>>, %arg2: memref<180x100xbf16, #tpu.memory_space<vmem>>, %arg3: memref<1x100xf32, #tpu.memory_space<vmem>>, %arg4: memref<100x50xbf16, #tpu.memory_space<vmem>>, %arg5: memref<1x50xf32, #tpu.memory_space<vmem>>, %arg6: memref<50x30xbf16, #tpu.memory_space<vmem>>, %arg7: memref<1x30xf32, #tpu.memory_space<vmem>>, %arg8: memref<16x30xf32, #tpu.memory_space<vmem>>) attributes {dimension_semantics = [#tpu.dimension_semantics<parallel>], iteration_bounds = array<i64: 3>, scalar_prefetch = 0 : i64, scratch_operands = 0 : i64, tpu.core_type = #tpu.core_type<tc>, window_params = [{transform_indices = @transform_0, window_bounds = array<i64: 16, 180>}, {pipeline_mode = #tpu.pipeline_mode<synchronous>, transform_indices = @transform_1, window_bounds = array<i64: 180, 100>}, {pipeline_mode = #tpu.pipeline_mode<synchronous>, transform_indices = @transform_2, window_bounds = array<i64: 1, 100>}, {pipeline_mode = #tpu.pipeline_mode<synchronous>, transform_indices = @transform_3, window_bounds = array<i64: 100, 50>}, {pipeline_mode = #tpu.pipeline_mode<synchronous>, transform_indices = @transform_4, window_bounds = array<i64: 1, 50>}, {pipeline_mode = #tpu.pipeline_mode<synchronous>, transform_indices = @transform_5, window_bounds = array<i64: 50, 30>}, {pipeline_mode = #tpu.pipeline_mode<synchronous>, transform_indices = @transform_6, window_bounds = array<i64: 1, 30>}, {transform_indices = @transform_7, window_bounds = array<i64: 16, 30>}]} {
    %c0 = arith.constant 0 : index
    %c0_0 = arith.constant 0 : index
    %0 = vector.load %arg1[%c0, %c0_0] : memref<16x180xf32, #tpu.memory_space<vmem>>, vector<16x180xf32>
    %1 = arith.truncf %0 : vector<16x180xf32> to vector<16x180xbf16>
    %c0_1 = arith.constant 0 : index
    %c0_2 = arith.constant 0 : index
    %2 = vector.load %arg2[%c0_1, %c0_2] : memref<180x100xbf16, #tpu.memory_space<vmem>>, vector<180x100xbf16>
    %cst = arith.constant dense<0.000000e+00> : vector<16x100xf32>
    %3 = tpu.matmul %1, %2, %cst {dimension_numbers = #tpu.dot_dimension_numbers<[1], [0], [0], [1], [0, 0, 1, 1], [], []>} : vector<16x180xbf16>, vector<180x100xbf16>, vector<16x100xf32> -> vector<16x100xf32>
    %c0_3 = arith.constant 0 : index
    %c0_4 = arith.constant 0 : index
    %4 = vector.load %arg3[%c0_3, %c0_4] : memref<1x100xf32, #tpu.memory_space<vmem>>, vector<1x100xf32>
    %5 = vector.broadcast %4 : vector<1x100xf32> to vector<16x100xf32>
    %6 = arith.addf %3, %5 : vector<16x100xf32>
    %cst_5 = arith.constant 0.000000e+00 : f32
    %7 = vector.broadcast %cst_5 : f32 to vector<16x100xf32>
    %8 = arith.maximumf %6, %7 : vector<16x100xf32>
    %9 = arith.truncf %8 : vector<16x100xf32> to vector<16x100xbf16>
    %c0_6 = arith.constant 0 : index
    %c0_7 = arith.constant 0 : index
    %10 = vector.load %arg4[%c0_6, %c0_7] : memref<100x50xbf16, #tpu.memory_space<vmem>>, vector<100x50xbf16>
    %cst_8 = arith.constant dense<0.000000e+00> : vector<16x50xf32>
    %11 = tpu.matmul %9, %10, %cst_8 {dimension_numbers = #tpu.dot_dimension_numbers<[1], [0], [0], [1], [0, 0, 1, 1], [], []>} : vector<16x100xbf16>, vector<100x50xbf16>, vector<16x50xf32> -> vector<16x50xf32>
    %c0_9 = arith.constant 0 : index
    %c0_10 = arith.constant 0 : index
    %12 = vector.load %arg5[%c0_9, %c0_10] : memref<1x50xf32, #tpu.memory_space<vmem>>, vector<1x50xf32>
    %13 = vector.broadcast %12 : vector<1x50xf32> to vector<16x50xf32>
    %14 = arith.addf %11, %13 : vector<16x50xf32>
    %cst_11 = arith.constant 0.000000e+00 : f32
    %15 = vector.broadcast %cst_11 : f32 to vector<16x50xf32>
    %16 = arith.maximumf %14, %15 : vector<16x50xf32>
    %17 = arith.truncf %16 : vector<16x50xf32> to vector<16x50xbf16>
    %c0_12 = arith.constant 0 : index
    %c0_13 = arith.constant 0 : index
    %18 = vector.load %arg6[%c0_12, %c0_13] : memref<50x30xbf16, #tpu.memory_space<vmem>>, vector<50x30xbf16>
    %cst_14 = arith.constant dense<0.000000e+00> : vector<16x30xf32>
    %19 = tpu.matmul %17, %18, %cst_14 {dimension_numbers = #tpu.dot_dimension_numbers<[1], [0], [0], [1], [0, 0, 1, 1], [], []>} : vector<16x50xbf16>, vector<50x30xbf16>, vector<16x30xf32> -> vector<16x30xf32>
    %c0_15 = arith.constant 0 : index
    %c0_16 = arith.constant 0 : index
    %20 = vector.load %arg7[%c0_15, %c0_16] : memref<1x30xf32, #tpu.memory_space<vmem>>, vector<1x30xf32>
    %21 = vector.broadcast %20 : vector<1x30xf32> to vector<16x30xf32>
    %22 = arith.addf %19, %21 : vector<16x30xf32>
    %c0_17 = arith.constant 0 : index
    %c0_18 = arith.constant 0 : index
    %23 = vector.load %arg8[%c0_17, %c0_18] : memref<16x30xf32, #tpu.memory_space<vmem>>, vector<16x30xf32>
    tpu.vector_store %arg8[%c0_17, %c0_18], %22 {strides = array<i32>} : memref<16x30xf32, #tpu.memory_space<vmem>>, vector<16x30xf32>,
    return
  }
  func.func @transform_0(%arg0: i32) -> (i32, i32) {
    %c0_i32 = arith.constant 0 : i32
    %c0_i32_0 = arith.constant 0 : i32
    return %arg0, %c0_i32 : i32, i32
  }
  func.func @transform_1(%arg0: i32) -> (i32, i32) {
    %c0_i32 = arith.constant 0 : i32
    %c0_i32_0 = arith.constant 0 : i32
    %c0_i32_1 = arith.constant 0 : i32
    return %c0_i32, %c0_i32_0 : i32, i32
  }
  func.func @transform_2(%arg0: i32) -> (i32, i32) {
    %c0_i32 = arith.constant 0 : i32
    %c0_i32_0 = arith.constant 0 : i32
    %c0_i32_1 = arith.constant 0 : i32
    return %c0_i32, %c0_i32_0 : i32, i32
  }
  func.func @transform_3(%arg0: i32) -> (i32, i32) {
    %c0_i32 = arith.constant 0 : i32
    %c0_i32_0 = arith.constant 0 : i32
    %c0_i32_1 = arith.constant 0 : i32
    return %c0_i32, %c0_i32_0 : i32, i32
  }
  func.func @transform_4(%arg0: i32) -> (i32, i32) {
    %c0_i32 = arith.constant 0 : i32
    %c0_i32_0 = arith.constant 0 : i32
    %c0_i32_1 = arith.constant 0 : i32
    return %c0_i32, %c0_i32_0 : i32, i32
  }
  func.func @transform_5(%arg0: i32) -> (i32, i32) {
    %c0_i32 = arith.constant 0 : i32
    %c0_i32_0 = arith.constant 0 : i32
    %c0_i32_1 = arith.constant 0 : i32
    return %c0_i32, %c0_i32_0 : i32, i32
  }
  func.func @transform_6(%arg0: i32) -> (i32, i32) {
    %c0_i32 = arith.constant 0 : i32
    %c0_i32_0 = arith.constant 0 : i32
    %c0_i32_1 = arith.constant 0 : i32
    return %c0_i32, %c0_i32_0 : i32, i32
  }
  func.func @transform_7(%arg0: i32) -> (i32, i32) {
    %c0_i32 = arith.constant 0 : i32
    %c0_i32_0 = arith.constant 0 : i32
    return %arg0, %c0_i32 : i32, i32
  }
}

</mosaic_0001>

<bundles_post_ra>
// kernel: tpu_custom_call.1
= control target key start
LH: loop header
LB: loop body
LE: loop exit
PB: predicated region body
PF: predicated region fallthrough
CT: control target
= control target key end

     0   :  { %12 = vsyncpa [#allocation3], 0  ;;  %s1552_s0 = inlined_call_operand.hbm [shape: f32[40,180], index: 0, kind: input, shape index: {}]   ;;  %s1553_s1 = inlined_call_operand.vmem [shape: bf16[180,100], index: 1, kind: input, shape index: {}]   ;;  %s1554_s2 = inlined_call_operand.vmem [shape: f32[1,100], index: 2, kind: input, shape index: {}]   ;;  %s1555_s3 = inlined_call_operand.vmem [shape: bf16[100,50], index: 3, kind: input, shape index: {}]   ;;  %s1556_s4 = inlined_call_operand.vmem [shape: f32[1,50], index: 4, kind: input, shape index: {}]   ;;  %s1557_s5 = inlined_call_operand.vmem [shape: bf16[50,30], index: 5, kind: input, shape index: {}]   ;;  %s1558_s6 = inlined_call_operand.vmem [shape: f32[1,30], index: 6, kind: input, shape index: {}]   ;;  %s1559_s7 = inlined_call_operand.vmem [shape: f32[40,30], index: 7, kind: output, shape index: {}]  }
   0x1   :  { %14 = vsyncpa [#allocation3 + $0x1], 0  ;;  %s1306_s24 = smov 0   ;;  %s1308_s25 = smov 0  }
   0x2   :  { %s1310_s26 = smov 0   ;;  %s1312_s27 = smov 0  }
   0x3 LB: > { %s1325_s28 = sadd.s32 4294967295, %s1226_s27   ;;  %s1328_s29 = sadd.s32 1, %s1226_s27   ;;  %s1226_s27 = sphi %s1312_s27, %s1565_s27   ;;  %s1222_s26 = sphi %s1310_s26, %s1564_s26   ;;  %s1218_s25 = sphi %s1308_s25, %s1563_s25   ;;  %s1214_s24 = sphi %s1306_s24, %s1562_s24  }
   0x4   : > { %s24_s30 = ssub.s32 %s1226_s27, %s1328_s29  ;;  %s27_s8 = sadd.s32 1, %s1222_s26 }
   0x5   : > { %p25_p0 = scmp.eq.s32.totalorder %s24_s30, 0  ;;  %p34_p1 = scmp.ne.s32.totalorder %s1222_s26, %s1218_s25 }
   0x6   : > { %p35_p2 = scmp.eq.s32.totalorder %s1226_s27, 0  ;;  %p40_p3 = scmp.ne.s32.totalorder %s1218_s25, %s1214_s24 }
   0x7   : > { %s1338_s9 = scalar_select %p25_p0, %s1222_s26, %s27_s8  }
   0x8   : > { %p36_p4 = por %p35_p2, %p34_p1  ;;  %p41_p5 = scmp.eq.s32.totalorder %s1325_s28, 0 }
   0x9   : > { %p190_p6 = scmp.eq.s32.totalorder %s1325_s28, 2  ;;  %p899_p9 = scmp.ge.s32.totalorder %s1226_s27, 3 }
   0xa   : > { %p1342_p7 = por %p41_p5, %p40_p3 }
   0xb   : > { %p1346_p8 = por %p190_p6, %p34_p1  ;;  %230 = sbr.rel (%p899_p9) target bundleno = 53 (0x35), region = 40 }
  0x12   : > { %233 = sbr.rel (!%p36_p4) target bundleno = 53 (0x35), region = 44  ;;  %s234_s12 = sand.u32 (%p36_p4), 1, %s1222_s26  }
  0x13   : > { %s901_s13 = sshll.u32 (%p36_p4), %s1226_s27, 1  ;;  %s900_s14 = sshll.u32 (%p36_p4), %s234_s12, 5 }
  0x14   : > { %s240_s15 = ssub.s32 (%p36_p4), 5, %s901_s13  ;;  %s1356_s18 = scalar_lea.sflag (%p36_p4), [#allocation3], %s234_s12 }
  0x15   : > { %p241_p10 = scmp.lt.s32.totalorder (%p36_p4), %s240_s15, 2  ;;  %s238_s19 = scalar_lea.vmem (%p36_p4), [#allocation2], %s900_s14 }
  0x19   : > { %s1567_s15 = smov (!%p241_p10, %s240_s15), 2 }
  0x1a   : > { %s1353_s16 = sshll.u32 %s1567_s15, 8 }
  0x1b   : > { %s246_s17 = ssub.s32 512, %s1353_s16 }
  0x1c   : > { %247 = vsyncadd %s1356_s18, %s246_s17  ;;  %p904_p11 = scmp.ne.s32.totalorder %s1353_s16, 0  ;;  %s960_s20 = sshll.u32 %s1226_s27, 9 }
  0x1d   : > { %s1364_s23 = scalar_lea.hbm %s1552_s0, %s960_s20  ;;  %s253_s24 = sshll.u32 %s238_s19, 4  ;;  %s1366_s24 = int_to_ptr.vmem [resolvable:$true] %s253_s24 }
  0x1e   : > { %s1132_s30 = scalar_lea.hbm %s1364_s23, %s1353_s16  ;;  %s1136_s13 = scalar_lea.hbm %s1552_s0, 1280 }
  0x1f   : > { %p1133_p12 = scmp.ne.s32.totalorder %s1364_s23, %s1132_s30  ;;  %p1137_p1 = scmp.lt.u32.totalorder %s1364_s23, %s1552_s0 }
  0x20   : > { %p1138_p2 = scmp.lt.u32.totalorder %s1136_s13, %s1132_s30  ;;  %p1140_p4 = scmp.lt.u32.totalorder %s1132_s30, %s1364_s23 }
  0x21   : > { %p1134_p13 = pnand %p1133_p12, %p904_p11 }
  0x22   : > { %p1139_p3 = por %p1138_p2, %p1137_p1 }
  0x23   : > { %p1135_p0 = pneg %p1134_p13 }
  0x24   : > { %p1141_p5 = por %p1140_p4, %p1139_p3 }
  0x26   : > { %p1142_p6 = pnand %p1141_p5, %p1135_p0 }
  0x28   : > { %1145 = shalt.err (!%p1142_p6)
}
  0x29   : > { %s1146_s17 = scalar_lea.vmem %s1366_s24, %s1353_s16  ;;  %s1260_s19 = smov [#allocation2]  }
  0x2a   : > { %p1147_p9 = scmp.ne.s32.totalorder %s1366_s24, %s1146_s17  ;;  %s1150_s20 = sshll.u32 %s1260_s19, 4  ;;  %s1151_s20 = int_to_ptr.vmem [resolvable:$false] %s1150_s20 }
  0x2b   : > { %s1152_s21 = scalar_lea.vmem %s1151_s20, 1024  ;;  %p1153_p13 = scmp.lt.s32.totalorder %s1366_s24, %s1151_s20 }
  0x2c   : > { %p1148_p10 = pnand %p1147_p9, %p904_p11  ;;  %p1154_p1 = scmp.lt.s32.totalorder %s1152_s21, %s1146_s17 }
  0x2e   : > { %p1149_p12 = pneg %p1148_p10  ;;  %p1155_p2 = por %p1154_p1, %p1153_p13 }
  0x30   : > { %p1156_p3 = pnand %p1155_p2, %p1149_p12 }
  0x32   : > { %1159 = shalt.err (!%p1156_p3)
}
  0x33   : > { %s1261_s22 = smov 256   ;;  %s1262_s30 = smov 16  }
  0x34   : > { %259 = dma.hbm_to_vmem [thread:$0]  (%p904_p11), %s1364_s23, %s1353_s16, %s1366_s24, %s1356_s18, %s1261_s22, %s1261_s22, %s1262_s30  }
  0x35 PF: > { %p909_p0 = scmp.ge.s32.totalorder %s1226_s27, 1  ;;  %p261_p4 = scmp.lt.s32.totalorder %s1226_s27, 4 }
  0x37   : > { %p262_p5 = pnand %p909_p0, %p261_p4 }
  0x38   : > { %s1396_s8 = sand.u32 (!%p262_p5), 1, %s1218_s25  }
  0x39   : > { %265 = sbr.rel (%p262_p5) target bundleno = 820 (0x334), region = 48  ;;  %s910_s12 = sshll.u32 (!%p262_p5), %s1396_s8, 5 }
  0x3a   : > { %s268_s13 = scalar_lea.sflag (!%p262_p5), [#allocation3], %s1396_s8  ;;  %s1400_s14 = scalar_lea.vmem (!%p262_p5), [#allocation2], %s910_s12 }
  0x40   : > { %1209 = dma.done.wait (%p1342_p7), %s268_s13, 512  }
  0x41   : > { %1211 = vsyncadd (%p1342_p7), %s268_s13, 4294966784  ;;  %v1263_v0 = vmov 0   ;;  %v1264_v1 = vmov 0.0   ;;  %v1109_v2 = vld [vmem:[%s1553_s1] sm:$0xff]   ;;  %v1110_v3 = vld [vmem:[%s1553_s1 + $0x8] sm:$0xff]   ;;  %vm418_vm0 = vcmask 424960  }
  0x42   : > { %426 = vmatprep.subr.bf16.mxu0 %v1263_v0  ;;  %977 = vmatprep.subr.bf16.mxu1 %v1264_v1  ;;  %v1111_v4 = vld [vmem:[%s1553_s1 + $0x10] sm:$0xff]   ;;  %v1112_v5 = vld [vmem:[%s1553_s1 + $0x18] sm:$0xff]   ;;  %v314_v6 = vld [vmem:[%s1400_s14 + $0x8] sm:$0xff]  ;;  %vm422_vm1 = vcmask 1041408   ;;  %vm1265_vm2 = vmmov 0   ;;  %vm529_vm3 = vcmask 818176  }
  0x43   : > { %427 = vmatpush1.bf16.msra.mxu0 %v1109_v2  ;;  %v316_v7 = vld [vmem:[%s1400_s14 + $0x18] sm:$0xff]  ;;  %v1121_v9 = vld [vmem:[%s1555_s3] sm:$0xff]   ;;  %v1122_v11 = vld [vmem:[%s1555_s3 + $0x8] sm:$0xff]   ;;  %991 = vmatprep.mubr.msk.bf16.mxu1 %vm1265_vm2, %v1264_v1  ;;  %vm619_vm4 = vcmask 1040384   ;;  %vm615_vm5 = vcmask 408576   ;;  %s911_s10 = sshll.u32 %s1396_s8, 4 }
  0x44   : > { %428 = vmatprep.subr.bf16.mxu0 %v1263_v0  ;;  %v318_v8 = vpack.c.bf16 %v316_v7, %v314_v6  ;;  %v1113_v10 = vld [vmem:[%s1553_s1 + $0x20] sm:$0xff]   ;;  %978 = vmatpush3.bf16.msra.mxu1 %v1121_v9  ;;  %v1114_v12 = vld [vmem:[%s1553_s1 + $0x28] sm:$0xff]   ;;  %v1123_v13 = vld [vmem:[%s1555_s3 + $0x10] sm:$0xff]   ;;  %vm664_vm6 = vcmask 244736   ;;  %s1504_s17 = scalar_lea.vmem [#allocation4], %s911_s10   ;;  %s942_s8 = sshll.u32 (%p1346_p8), %s1325_s28, 1 }
  0x45   : > { %979 = vmatprep.subr.bf16.mxu1 %v1264_v1  ;;  %v1115_v14 = vld [vmem:[%s1553_s1 + $0x30] sm:$0xff]   ;;  %v1124_v15 = vld [vmem:[%s1555_s3 + $0x18] sm:$0xff]   ;;  %v1125_v17 = vld [vmem:[%s1555_s3 + $0x20] sm:$0xff]   ;;  %s675_s19 = ssub.s32 (%p1346_p8), 5, %s942_s8 }
  0x46   : > { %925 = vmatprep.mubr.msk.bf16.mxu0 %vm418_vm0, %v318_v8  ;;  %v1116_v16 = vld [vmem:[%s1553_s1 + $0x38] sm:$0xff]   ;;  %v1117_v18 = vld [vmem:[%s1553_s1 + $0x40] sm:$0xff]   ;;  %v1118_v19 = vld [vmem:[%s1553_s1 + $0x48] sm:$0xff]   ;;  %p676_p7 = scmp.lt.s32.totalorder (%p1346_p8), %s675_s19, 2 }
  0x47   : > { %429 = vmatpush1.bf16.msra.mxu0 %v1110_v3  ;;  %v1119_v20 = vld [vmem:[%s1553_s1 + $0x50] sm:$0xff]   ;;  %v1120_v21 = vld [vmem:[%s1553_s1 + $0x58] ss:$0 sps:$4 sm:$0x33]   ;;  %v313_v22 = vld [vmem:[%s1400_s14] sm:$0xff] }
  0x48   : > { %430 = vmatprep.subr.bf16.mxu0 %v1263_v0  ;;  %980 = vmatpush3.bf16.msra.mxu1 %v1122_v11  ;;  %v315_v23 = vld [vmem:[%s1400_s14 + $0x10] sm:$0xff]  ;;  %v424_v24 = vsel %vm422_vm1, %v1120_v21, 0  ;;  %v1126_v26 = vld [vmem:[%s1555_s3 + $0x28] sm:$0xff]   ;;  %v912_v29 = vld [vmem:[%s1554_s2] ss:$0 sm:$0xff]  ;;  %s961_s14 = sshll.u32 (%p1346_p8), %s1325_s28, 4 }
  0x49   : > { %981 = vmatprep.subr.bf16.mxu1 %v1264_v1  ;;  %v317_v25 = vpack.c.bf16 %v315_v23, %v313_v22  ;;  %v1127_v27 = vld [vmem:[%s1555_s3 + $0x30] ss:$0 sps:$4 sm:$0x33]   ;;  %v1128_v38 = vld [vmem:[%s1557_s5] sm:$0xff]   ;;  %v1129_v40 = vld [vmem:[%s1557_s5 + $0x8] sm:$0xff]   ;;  %s1515_s22 = scalar_lea.vmem (%p1346_p8), %s1559_s7, %s961_s14  }
  0x4a   : > { %v534_v28 = vsel %vm422_vm1, %v1127_v27, 0  ;;  %v1130_v41 = vld [vmem:[%s1557_s5 + $0x10] sm:$0xff]   ;;  %v1131_v42 = vld [vmem:[%s1557_s5 + $0x18] ss:$0 sps:$4 sm:$0x11]  }
  0x4b   : > { %431 = vmatpush1.bf16.msra.mxu0 %v1111_v4  ;;  %v621_v43 = vsel %vm619_vm4, %v1131_v42, 0  ;;  %v926_v44 = vld [vmem:[%s1556_s4] ss:$0 sm:$0xff] }
  0x4c   : > { %432 = vmatprep.subr.bf16.mxu0 %v1263_v0  ;;  %982 = vmatpush3.bf16.msra.mxu1 %v1123_v13  ;;  %v935_v54 = vld [vmem:[%s1558_s6] ss:$0 sm:$0xff] }
  0x4d   : > { %983 = vmatprep.subr.bf16.mxu1 %v1264_v1 }
  0x4f   : > { %433 = vmatpush1.bf16.msra.mxu0 %v1112_v5 }
  0x50   : > { %434 = vmatprep.subr.bf16.mxu0 %v1263_v0  ;;  %984 = vmatpush3.bf16.msra.mxu1 %v1124_v15 }
  0x51   : > { %985 = vmatprep.subr.bf16.mxu1 %v1264_v1 }
  0x53   : > { %435 = vmatpush1.bf16.msra.mxu0 %v1113_v10 }
  0x54   : > { %436 = vmatprep.subr.bf16.mxu0 %v1263_v0  ;;  %986 = vmatpush3.bf16.msra.mxu1 %v1125_v17 }
  0x55   : > { %987 = vmatprep.subr.bf16.mxu1 %v1264_v1 }
  0x57   : > { %437 = vmatpush1.bf16.msra.mxu0 %v1114_v12 }
  0x58   : > { %438 = vmatprep.subr.bf16.mxu0 %v1263_v0  ;;  %988 = vmatpush3.bf16.msra.mxu1 %v1126_v26 }
  0x59   : > { %989 = vmatprep.subr.bf16.mxu1 %v1264_v1 }
  0x5b   : > { %439 = vmatpush1.bf16.msra.mxu0 %v1115_v14 }
  0x5c   : > { %440 = vmatprep.subr.bf16.mxu0 %v1263_v0  ;;  %990 = vmatpush3.bf16.msra.mxu1 %v534_v28 }
  0x5d   : > { %995 = vmatprep.subr.bf16.mxu1 %v1264_v1 }
  0x5f   : > { %441 = vmatpush1.bf16.msra.mxu0 %v1116_v16 }
  0x60   : > { %442 = vmatprep.subr.bf16.mxu0 %v1263_v0 }
  0x63   : > { %443 = vmatpush1.bf16.msra.mxu0 %v1117_v18 }
  0x64   : > { %444 = vmatprep.subr.bf16.mxu0 %v1263_v0 }
  0x67   : > { %445 = vmatpush1.bf16.msra.mxu0 %v1118_v19 }
  0x68   : > { %446 = vmatprep.subr.bf16.mxu0 %v1263_v0 }
  0x6b   : > { %447 = vmatpush1.bf16.msra.mxu0 %v1119_v20 }
  0x6c   : > { %448 = vmatprep.subr.bf16.mxu0 %v1263_v0 }
  0x6f   : > { %449 = vmatpush1.bf16.msra.mxu0 %v424_v24 }
  0x72   : > { %459 = vmatmul.mubr.bf16.vlgmr.msra.gmra.mrb[0].mxu0 %v317_v25 }
 0x145   : > { %v460_v30 = vpop.f32.mrb[0].mxu0 }
 0x146   : > { %v461_v31 = vadd.f32 %v912_v29, %v460_v30  ;;  %v462_v32 = vpop.f32.mrb[1].mxu0 }
 0x147   : > { %v463_v33 = vpop.f32.mrb[2].mxu0 }
 0x148   : > { %v464_v34 = vadd.f32 %v912_v29, %v463_v33  ;;  %v465_v35 = vpop.f32.mrb[3].mxu0  ;;  %v467_v36 = vmax.f32 %v461_v31, 0.0 }
 0x14a   : > { %v468_v37 = vmax.f32 %v464_v34, 0.0 }
 0x14c   : > { %v469_v39 = vpack.c.bf16 %v468_v37, %v467_v36 }
 0x14e   : > { %992 = vmatmul.mubr.msk.bf16.vlgmr.msra.gmra.mrb[0].mxu1 %vm529_vm3, %v469_v39 }
 0x14f   : > { %996 = vmatpush3.bf16.msra.mxu1 %v1128_v38  ;;  %1003 = vmatprep.mubr.msk.bf16.mxu1 %vm1265_vm2, %v1264_v1 }
 0x150   : > { %997 = vmatprep.subr.bf16.mxu1 %v1264_v1 }
 0x153   : > { %998 = vmatpush3.bf16.msra.mxu1 %v1129_v40 }
 0x154   : > { %999 = vmatprep.subr.bf16.mxu1 %v1264_v1 }
 0x157   : > { %1000 = vmatpush3.bf16.msra.mxu1 %v1130_v41 }
 0x158   : > { %1001 = vmatprep.subr.bf16.mxu1 %v1264_v1 }
 0x15b   : > { %1002 = vmatpush3.bf16.msra.mxu1 %v621_v43 }
 0x221   : > { %v570_v45 = vpop.f32.mrb[0].mxu1 }
 0x222   : > { %v571_v46 = vadd.f32 %v926_v44, %v570_v45  ;;  %v993_v47 = vpop.f32.mrb[1].mxu1 }
 0x223   : > { %v573_v48 = vpop.f32.mrb[2].mxu1 }
 0x224   : > { %v574_v49 = vadd.f32 %v926_v44, %v573_v48  ;;  %v994_v50 = vpop.f32.mrb[3].mxu1  ;;  %v577_v51 = vmax.f32 %v571_v46, 0.0 }
 0x226   : > { %v578_v52 = vmax.f32 %v574_v49, 0.0 }
 0x228   : > { %v579_v53 = vpack.c.bf16 %v578_v52, %v577_v51 }
 0x22a   : > { %1004 = vmatmul.mubr.msk.bf16.vlgmr.msra.gmra.mrb[4].mxu1 %vm615_vm5, %v579_v53 }
 0x2fc   : > { %673 = sbr.rel (!%p1346_p8) target bundleno = 820 (0x334), region = 56 }
 0x2fd   : > { %v657_v55 = vpop.f32.mrb[4].mxu1 }
 0x2fe   : > { %v658_v56 = vadd.f32 %v935_v54, %v657_v55  ;;  %v1005_v57 = vpop.f32.mrb[5].mxu1 }
 0x2ff   : > { %v660_v58 = vpop.f32.mrb[6].mxu1 }
 0x300   : > { %665 = vst.msk [vmem:[%s1504_s17] sm:$0xff] %vm664_vm6, %v658_v56  ;;  %v661_v59 = vadd.f32 %v935_v54, %v660_v58  ;;  %v1006_v60 = vpop.f32.mrb[7].mxu1 }
 0x302   : > { %666 = vst.msk [vmem:[%s1504_s17 + $0x8] sm:$0xff] %vm664_vm6, %v661_v59 }
 0x303   : > { %s1569_s19 = smov (!%p676_p7, %s675_s19), 2 }
 0x304   : > { %s943_s30 = sshll.u32 %s1569_s19, 7 }
 0x305   : > { %p946_p11 = scmp.eq.s32.totalorder %s943_s30, 0 }
 0x306   : > { %s1521_s11 = sshrl.u32 (!%p946_p11), %s1569_s19, 1 }
 0x307   : > { %684 = sbr.rel (%p946_p11) target bundleno = 820 (0x334), region = 60  ;;  %p947_p8 = scmp.le.s32.totalorder (!%p946_p11), %s1521_s11, 0 }
 0x30e   : > { %850 = sbr.rel (%p947_p8) target bundleno = 799 (0x31f), region = 142  ;;  %s1228_s28 = smov (!%p947_p8), %s1515_s22  }
 0x30f   : > { %s1232_s12 = smov (!%p947_p8), %s1504_s17   ;;  %s1236_s13 = smov (!%p947_p8), 0  }
 0x310   : > { %s1240_s27 = smov (!%p947_p8), 0  }
 0x315 LB: >> { %v748_v61 = vld [vmem:[%s1234_s12] sm:$0xff]  ;;  %v750_v62 = vld [vmem:[%s1234_s12 + $0x8] sm:$0xff]  ;;  %s752_s16 = sadd.s32 1, %s1238_s13  ;;  %s742_s27 = sadd.s32 1, %s1242_s27   ;;  %s1242_s27 = sphi %s1240_s27, %s742_s27   ;;  %s1238_s13 = sphi %s1236_s13, %s1237_s13   ;;  %s1234_s12 = sphi %s1232_s12, %s757_s12   ;;  %s1230_s28 = sphi %s1228_s28, %s758_s28  }
 0x316   : >> { %749 = vst [vmem:[%s1230_s28] sm:$0xff] %v748_v61  ;;  %751 = vst [vmem:[%s1230_s28 + $0x8] sm:$0xff] %v750_v62  ;;  %p753_p6 = scmp.ge.s32.totalorder %s752_s16, %s1521_s11  ;;  %p741_p9 = scmp.ge.s32.totalorder %s742_s27, %s1521_s11 }
 0x318   : >> { %s1571_s16 = smov (%p753_p6, %s752_s16), 0  ;;  %744 = sbr.rel (!%p741_p9) target bundleno = 789 (0x315), region = 148 }
 0x319   : >> { %s948_s18 = sshll.u32 %s1571_s16, 4  ;;  %s1237_s13 = smov %s1571_s16  }
 0x31a   : >> { %s757_s12 = scalar_lea.vmem %s1504_s17, %s948_s18 [#allocation4]   ;;  %s758_s28 = scalar_lea.vmem %s1515_s22, %s948_s18  }
 0x31f PF: > { %s1531_s23 = sand.u32 1, %s1569_s19   ;;  %s962_s10 = sshll.u32 %s1521_s11, 4 }
 0x320   : > { %s763_s24 = scalar_lea.vmem %s1504_s17, %s962_s10 [#allocation4]   ;;  %s765_s15 = scalar_lea.vmem %s1515_s22, %s962_s10  }
 0x321   : > { %p953_p10 = scmp.le.s32.totalorder %s1531_s23, 0 }
 0x322   : > { %s1244_s8 = smov (!%p953_p10), %s765_s15   ;;  %s1248_s14 = smov (!%p953_p10), %s763_s24  }
 0x323   : > { %864 = sbr.rel (%p953_p10) target bundleno = 820 (0x334), region = 153  ;;  %s1252_s20 = smov (!%p953_p10), 0  }
 0x324   : > { %s1256_s21 = smov (!%p953_p10), 0  }
 0x32a LB: >> { %v775_v63 = vld [vmem:[%s1250_s14] sm:$0xff]  ;;  %s777_s19 = sadd.s32 1, %s1254_s20  ;;  %s769_s21 = sadd.s32 1, %s1258_s21   ;;  %s1258_s21 = sphi %s1256_s21, %s769_s21   ;;  %s1254_s20 = sphi %s1252_s20, %s1253_s20   ;;  %s1250_s14 = sphi %s1248_s14, %s782_s14   ;;  %s1246_s8 = sphi %s1244_s8, %s783_s8  }
 0x32b   : >> { %776 = vst [vmem:[%s1246_s8] sm:$0xff] %v775_v63  ;;  %p778_p12 = scmp.ge.s32.totalorder %s777_s19, %s1531_s23  ;;  %p768_p13 = scmp.ge.s32.totalorder %s769_s21, %s1531_s23 }
 0x32d   : >> { %s1573_s19 = smov (%p778_p12, %s777_s19), 0  ;;  %771 = sbr.rel (!%p768_p13) target bundleno = 810 (0x32a), region = 159 }
 0x32e   : >> { %s954_s17 = sshll.u32 %s1573_s19, 3  ;;  %s1253_s20 = smov %s1573_s19  }
 0x32f   : >> { %s782_s14 = scalar_lea.vmem %s763_s24, %s954_s17 [#allocation4]   ;;  %s783_s8 = scalar_lea.vmem %s765_s15, %s954_s17  }
 0x334 PF: > { %p17_p1 = scmp.ge.s32.totalorder %s1328_s29, 5   ;;  %s1562_s24 = smov %s1218_s25 }
 0x335   : > { %s1563_s25 = smov %s1222_s26  ;;  %s1564_s26 = smov %s1338_s9 }
 0x336   : > { %s1565_s27 = smov %s1328_s29  ;;  %19 = sbr.rel (!%p17_p1) target bundleno = 3 (0x3), region = 170 }
 0x33d   :  { %799 = vsyncpa [#allocation3], 1 }
 0x33e   :  { %801 = vsyncpa [#allocation3 + $0x1], 1 }

</bundles_post_ra>
